<compile_context>
chip_gen: v6e
topology: v6e:2x2x1
jax: 0.10.0
libtpu: 0.0.40
codegen_flags: <defaults>
</compile_context>

<pallas_src>
import functools
import math

import jax
import jax.numpy as jnp
from jax.experimental import pallas as pl
from jax.experimental.pallas import tpu as pltpu


_INV_SQRT2 = 1.0 / math.sqrt(2.0)


def _ffn_kernel(x_ref, w0_ref, w1_ref, w2_ref, bias_ref, wout_ref, bout_ref,
                o_ref, *, H, d, WFh):
    """One batch image per grid step; every operand is lane-dense.

    x_ref   : (1, H, W*C)    input image, NHWC flattened onto the lane axis (f32)
    w0/1/2  : (W*C, 2*W*Fh)  fused project_in + horizontal-tap + wdw-scale
                             block matrices for ky = 0,1,2 (bf16)
    bias    : (H, 2*W*Fh)    position-dependent (border-masked) dwconv bias (f32)
    wout    : (W*Fh, W*C)    block-diagonal project_out (bf16)
    bout    : (1, W*C)       project_out bias tiled over W (f32)
    o_ref   : (1, H, W*C)    output image
    """
    xb = x_ref[0].astype(jnp.bfloat16)                      # (H, W*C)
    z = jnp.zeros((d, xb.shape[1]), jnp.bfloat16)
    x_m = jnp.concatenate([z, xb[:H - d, :]], axis=0)       # row h -> x[h - d]
    x_p = jnp.concatenate([xb[d:, :], z], axis=0)           # row h -> x[h + d]

    # project_in + full dilated 3x3 depthwise conv, both gate halves fused on N.
    acc = jnp.dot(x_m, w0_ref[...], preferred_element_type=jnp.float32)
    acc = acc + jnp.dot(xb, w1_ref[...], preferred_element_type=jnp.float32)
    acc = acc + jnp.dot(x_p, w2_ref[...], preferred_element_type=jnp.float32)
    acc = acc + bias_ref[...]                               # (H, 2*W*Fh)

    a1 = acc[:, :WFh]                                       # 128-aligned free views
    a2 = acc[:, WFh:]

    # exact-erf GELU gate (PyTorch F.gelu default)
    g = 0.5 * a1 * (1.0 + jax.lax.erf(a1 * _INV_SQRT2)) * a2

    out = jnp.dot(g.astype(jnp.bfloat16), wout_ref[...],
                  preferred_element_type=jnp.float32) + bout_ref[...]
    o_ref[0] = out.astype(o_ref.dtype)


def prepare_ffn_weights(params, dilation, H, W):
    """Expand the per-channel conv weights into the fused block matrices.

    Call once per parameter set (hoisted out of the per-call wrapper)."""
    w_in, b_in, w_dw, b_dw, w_out, b_out = params
    f32 = jnp.float32
    w_in, b_in = w_in.astype(f32), b_in.astype(f32)
    w_dw, b_dw = w_dw.astype(f32), b_dw.astype(f32)
    w_out, b_out = w_out.astype(f32), b_out.astype(f32)

    C, F2 = w_in.shape
    Fh = F2 // 2
    d = int(dilation)
    WC, WFh = W * C, W * Fh

    # Horizontal shift matrices on the W axis: S_kx[w', w] = 1 iff w' = w + (kx-1)*d
    S = [jnp.eye(W, k=(1 - kx) * d, dtype=f32) for kx in range(3)]

    # W_ky[w'*C+c, (g*W + ... ) ...]: fused project_in + kx shift + wdw scale.
    w_ky = []
    for ky in range(3):
        halves = []
        for g in range(2):
            wg = w_in[:, g * Fh:(g + 1) * Fh]                       # (C, Fh)
            blk = jnp.zeros((WC, WFh), f32)
            for kx in range(3):
                scale = w_dw[ky, kx, g * Fh:(g + 1) * Fh]           # (Fh,)
                blk = blk + jnp.kron(S[kx], wg * scale[None, :])
            halves.append(blk)
        w_ky.append(jnp.concatenate(halves, axis=1).astype(jnp.bfloat16))  # (WC, 2*WFh)
    w0, w1, w2 = w_ky

    # Position-dependent bias slab: b_dw + b_in * (sum of in-range taps' dw weights).
    k_idx = jnp.arange(3)
    h_idx = jnp.arange(H)
    w_idx = jnp.arange(W)
    row_ok = ((h_idx[:, None] + (k_idx[None, :] - 1) * d >= 0) &
              (h_idx[:, None] + (k_idx[None, :] - 1) * d < H)).astype(f32)   # (H, 3)
    col_ok = ((w_idx[:, None] + (k_idx[None, :] - 1) * d >= 0) &
              (w_idx[:, None] + (k_idx[None, :] - 1) * d < W)).astype(f32)   # (W, 3)
    tap_sum = jnp.einsum('hy,wx,yxf->hwf', row_ok, col_ok, w_dw)             # (H, W, F2)
    bias_hw = tap_sum * b_in[0][None, None, :] + b_dw[0][None, None, :]      # (H, W, F2)
    bias_slab = jnp.concatenate(
        [bias_hw[:, :, :Fh].reshape(H, WFh),
         bias_hw[:, :, Fh:].reshape(H, WFh)], axis=1)                        # (H, 2*WFh)

    wout = jnp.kron(jnp.eye(W, dtype=f32), w_out).astype(jnp.bfloat16)       # (WFh, WC)
    bout = jnp.tile(b_out, (1, W))                                           # (1, WC)

    meta = dict(H=H, W=W, C=C, Fh=Fh, d=d)
    return (w0, w1, w2, bias_slab, wout, bout), meta


def feedforward_dilated(x, prepared, meta):
    """x: (B, H, W, C) NHWC float32.  Returns (B, H, W, C)."""
    B, H, W, C = x.shape
    assert H == meta['H'] and W == meta['W'] and C == meta['C']
    Fh, d = meta['Fh'], meta['d']
    WC, WFh = W * C, W * Fh
    w0, w1, w2, bias_slab, wout, bout = prepared

    x2 = x.reshape(B, H, WC)                 # lane-dense I/O slab

    kernel = functools.partial(_ffn_kernel, H=H, d=d, WFh=WFh)

    flops = int(B * (3 * 2 * H * WC * (2 * WFh) + 2 * H * WFh * WC))
    transcendentals = int(B * H * WFh)
    bytes_accessed = int(
        2 * x2.size * 4                      # read + write of the image slabs
        + sum(a.size * a.dtype.itemsize for a in (w0, w1, w2, bias_slab, wout, bout)))

    grid_spec = pltpu.PrefetchScalarGridSpec(
        num_scalar_prefetch=0,
        grid=(B,),
        in_specs=[
            pl.BlockSpec((1, H, WC), lambda b: (b, 0, 0)),
            pl.BlockSpec((WC, 2 * WFh), lambda b: (0, 0)),
            pl.BlockSpec((WC, 2 * WFh), lambda b: (0, 0)),
            pl.BlockSpec((WC, 2 * WFh), lambda b: (0, 0)),
            pl.BlockSpec((H, 2 * WFh), lambda b: (0, 0)),
            pl.BlockSpec((WFh, WC), lambda b: (0, 0)),
            pl.BlockSpec((1, WC), lambda b: (0, 0)),
        ],
        out_specs=pl.BlockSpec((1, H, WC), lambda b: (b, 0, 0)),
    )

    out2 = pl.pallas_call(
        kernel,
        out_shape=jax.ShapeDtypeStruct((B, H, WC), x.dtype),
        grid_spec=grid_spec,
        compiler_params=pltpu.CompilerParams(
            dimension_semantics=("parallel",)),
        cost_estimate=pl.CostEstimate(flops=flops,
                                      transcendentals=transcendentals,
                                      bytes_accessed=bytes_accessed),
    )(x2, w0, w1, w2, bias_slab, wout, bout)
    return out2.reshape(B, H, W, C)


def feedforward_dilated_reference(x, params, dilation):
    """Pure-JAX f32 reference of the PyTorch forward (NHWC layout)."""
    w_in, b_in, w_dw, b_dw, w_out, b_out = params
    d = int(dilation)
    B, H, W, C = x.shape
    Fh = w_out.shape[0]
    y = jnp.einsum('bhwc,cf->bhwf', x, w_in) + b_in[0]
    yp = jnp.pad(y, ((0, 0), (d, d), (d, d), (0, 0)))
    acc = jnp.zeros_like(y)
    for ky in range(3):
        for kx in range(3):
            acc = acc + yp[:, ky * d:ky * d + H, kx * d:kx * d + W, :] * w_dw[ky, kx, :]
    acc = acc + b_dw[0]
    x1, x2 = acc[..., :Fh], acc[..., Fh:]
    g = 0.5 * x1 * (1.0 + jax.lax.erf(x1 / jnp.sqrt(2.0))) * x2
    return jnp.einsum('bhwf,fc->bhwc', g, w_out) + b_out[0]


def init_params(key, dim, ffn_expansion_factor):
    """Deterministic synthetic parameters matching nn.Conv2d shapes
    (collapsed: 1x1 conv weights -> (Cin, Cout), depthwise -> (3, 3, Cmid))."""
    hidden = int(dim * ffn_expansion_factor)
    F2 = hidden * 2
    k = jax.random.split(key, 6)
    w_in = jax.random.normal(k[0], (dim, F2), jnp.float32) * 0.1
    b_in = jax.random.normal(k[1], (1, F2), jnp.float32) * 0.1
    w_dw = jax.random.normal(k[2], (3, 3, F2), jnp.float32) * 0.1
    b_dw = jax.random.normal(k[3], (1, F2), jnp.float32) * 0.1
    w_out = jax.random.normal(k[4], (hidden, dim), jnp.float32) * 0.1
    b_out = jax.random.normal(k[5], (1, dim), jnp.float32) * 0.1
    return (w_in, b_in, w_dw, b_dw, w_out, b_out)


if __name__ == "__main__":
    # Module config: dim=8, ffn_expansion_factor=2 -> hidden=16, stride(dilation)=2, bias=True
    dim = 8
    ffn_expansion_factor = 2
    stride = 2           # used as both dilation and padding in the dwconv
    B, H, W = 2, 16, 16  # W * dim = 128 -> exactly one lane group for I/O

    key = jax.random.PRNGKey(0)
    kx, kp = jax.random.split(key)
    # PyTorch input would be NCHW (B, dim, H, W); we use NHWC (B, H, W, dim).
    x = jax.random.normal(kx, (B, H, W, dim), jnp.float32)
    params = init_params(kp, dim, ffn_expansion_factor)

    # Weight expansion hoisted out of the call path (done once per param set).
    prepared, meta = prepare_ffn_weights(params, stride, H, W)
    prepared = jax.block_until_ready(prepared)

    out = feedforward_dilated(x, prepared, meta)
    out = jax.block_until_ready(out)

    ref = feedforward_dilated_reference(x, params, stride)
    assert out.shape == (B, H, W, dim)
    assert jnp.allclose(out, ref, atol=1e-3, rtol=1e-3), "mismatch vs reference"

    print("KERNEL_OK")
</pallas_src>

<mosaic_0001>
module attributes {stable_mosaic.version = 11 : i64} {
  func.func @_ffn_kernel(%arg0: i32, %arg1: memref<1x16x128xf32, #tpu.memory_space<vmem>>, %arg2: memref<128x512xbf16, #tpu.memory_space<vmem>>, %arg3: memref<128x512xbf16, #tpu.memory_space<vmem>>, %arg4: memref<128x512xbf16, #tpu.memory_space<vmem>>, %arg5: memref<16x512xf32, #tpu.memory_space<vmem>>, %arg6: memref<256x128xbf16, #tpu.memory_space<vmem>>, %arg7: memref<1x128xf32, #tpu.memory_space<vmem>>, %arg8: memref<1x16x128xf32, #tpu.memory_space<vmem>>) attributes {dimension_semantics = [#tpu.dimension_semantics<parallel>], iteration_bounds = array<i64: 2>, scalar_prefetch = 0 : i64, scratch_operands = 0 : i64, tpu.core_type = #tpu.core_type<tc>, window_params = [{transform_indices = @transform_0, window_bounds = array<i64: 1, 16, 128>}, {pipeline_mode = #tpu.pipeline_mode<synchronous>, transform_indices = @transform_1, window_bounds = array<i64: 128, 512>}, {pipeline_mode = #tpu.pipeline_mode<synchronous>, transform_indices = @transform_2, window_bounds = array<i64: 128, 512>}, {pipeline_mode = #tpu.pipeline_mode<synchronous>, transform_indices = @transform_3, window_bounds = array<i64: 128, 512>}, {pipeline_mode = #tpu.pipeline_mode<synchronous>, transform_indices = @transform_4, window_bounds = array<i64: 16, 512>}, {pipeline_mode = #tpu.pipeline_mode<synchronous>, transform_indices = @transform_5, window_bounds = array<i64: 256, 128>}, {pipeline_mode = #tpu.pipeline_mode<synchronous>, transform_indices = @transform_6, window_bounds = array<i64: 1, 128>}, {transform_indices = @transform_7, window_bounds = array<i64: 1, 16, 128>}]} {
    %c0 = arith.constant 0 : index
    %c0_0 = arith.constant 0 : index
    %c0_1 = arith.constant 0 : index
    %0 = vector.load %arg1[%c0, %c0_0, %c0_1] : memref<1x16x128xf32, #tpu.memory_space<vmem>>, vector<1x16x128xf32>
    %1 = vector.shape_cast %0 : vector<1x16x128xf32> to vector<16x128xf32>
    %2 = arith.truncf %1 : vector<16x128xf32> to vector<16x128xbf16>
    %cst = arith.constant 0.000000e+00 : bf16
    %3 = vector.broadcast %cst : bf16 to vector<2x128xbf16>
    %4 = vector.extract_strided_slice %2 {offsets = [0, 0], sizes = [14, 128], strides = [1, 1]} : vector<16x128xbf16> to vector<14x128xbf16>
    %5 = tpu.concatenate %3, %4 in 0 : vector<2x128xbf16>, vector<14x128xbf16> -> vector<16x128xbf16>
    %6 = vector.extract_strided_slice %2 {offsets = [2, 0], sizes = [14, 128], strides = [1, 1]} : vector<16x128xbf16> to vector<14x128xbf16>
    %7 = tpu.concatenate %6, %3 in 0 : vector<14x128xbf16>, vector<2x128xbf16> -> vector<16x128xbf16>
    %c0_2 = arith.constant 0 : index
    %c0_3 = arith.constant 0 : index
    %8 = vector.load %arg2[%c0_2, %c0_3] : memref<128x512xbf16, #tpu.memory_space<vmem>>, vector<128x512xbf16>
    %cst_4 = arith.constant dense<0.000000e+00> : vector<16x512xf32>
    %9 = tpu.matmul %5, %8, %cst_4 {dimension_numbers = #tpu.dot_dimension_numbers<[1], [0], [0], [1], [0, 0, 1, 1], [], []>} : vector<16x128xbf16>, vector<128x512xbf16>, vector<16x512xf32> -> vector<16x512xf32>
    %c0_5 = arith.constant 0 : index
    %c0_6 = arith.constant 0 : index
    %10 = vector.load %arg3[%c0_5, %c0_6] : memref<128x512xbf16, #tpu.memory_space<vmem>>, vector<128x512xbf16>
    %cst_7 = arith.constant dense<0.000000e+00> : vector<16x512xf32>
    %11 = tpu.matmul %2, %10, %cst_7 {dimension_numbers = #tpu.dot_dimension_numbers<[1], [0], [0], [1], [0, 0, 1, 1], [], []>} : vector<16x128xbf16>, vector<128x512xbf16>, vector<16x512xf32> -> vector<16x512xf32>
    %12 = arith.addf %9, %11 : vector<16x512xf32>
    %c0_8 = arith.constant 0 : index
    %c0_9 = arith.constant 0 : index
    %13 = vector.load %arg4[%c0_8, %c0_9] : memref<128x512xbf16, #tpu.memory_space<vmem>>, vector<128x512xbf16>
    %cst_10 = arith.constant dense<0.000000e+00> : vector<16x512xf32>
    %14 = tpu.matmul %7, %13, %cst_10 {dimension_numbers = #tpu.dot_dimension_numbers<[1], [0], [0], [1], [0, 0, 1, 1], [], []>} : vector<16x128xbf16>, vector<128x512xbf16>, vector<16x512xf32> -> vector<16x512xf32>
    %15 = arith.addf %12, %14 : vector<16x512xf32>
    %c0_11 = arith.constant 0 : index
    %c0_12 = arith.constant 0 : index
    %16 = vector.load %arg5[%c0_11, %c0_12] : memref<16x512xf32, #tpu.memory_space<vmem>>, vector<16x512xf32>
    %17 = arith.addf %15, %16 : vector<16x512xf32>
    %18 = vector.extract_strided_slice %17 {offsets = [0, 0], sizes = [16, 256], strides = [1, 1]} : vector<16x512xf32> to vector<16x256xf32>
    %19 = vector.extract_strided_slice %17 {offsets = [0, 256], sizes = [16, 256], strides = [1, 1]} : vector<16x512xf32> to vector<16x256xf32>
    %cst_13 = arith.constant 5.000000e-01 : f32
    %20 = vector.broadcast %cst_13 : f32 to vector<16x256xf32>
    %21 = arith.mulf %20, %18 : vector<16x256xf32>
    %cst_14 = arith.constant 0.707106769 : f32
    %22 = vector.broadcast %cst_14 : f32 to vector<16x256xf32>
    %23 = arith.mulf %18, %22 : vector<16x256xf32>
    %24 = math.erf %23 : vector<16x256xf32>
    %cst_15 = arith.constant 1.000000e+00 : f32
    %25 = vector.broadcast %cst_15 : f32 to vector<16x256xf32>
    %26 = arith.addf %25, %24 : vector<16x256xf32>
    %27 = arith.mulf %21, %26 : vector<16x256xf32>
    %28 = arith.mulf %27, %19 : vector<16x256xf32>
    %29 = arith.truncf %28 : vector<16x256xf32> to vector<16x256xbf16>
    %c0_16 = arith.constant 0 : index
    %c0_17 = arith.constant 0 : index
    %30 = vector.load %arg6[%c0_16, %c0_17] : memref<256x128xbf16, #tpu.memory_space<vmem>>, vector<256x128xbf16>
    %cst_18 = arith.constant dense<0.000000e+00> : vector<16x128xf32>
    %31 = tpu.matmul %29, %30, %cst_18 {dimension_numbers = #tpu.dot_dimension_numbers<[1], [0], [0], [1], [0, 0, 1, 1], [], []>} : vector<16x256xbf16>, vector<256x128xbf16>, vector<16x128xf32> -> vector<16x128xf32>
    %c0_19 = arith.constant 0 : index
    %c0_20 = arith.constant 0 : index
    %32 = vector.load %arg7[%c0_19, %c0_20] : memref<1x128xf32, #tpu.memory_space<vmem>>, vector<1x128xf32>
    %33 = vector.broadcast %32 : vector<1x128xf32> to vector<16x128xf32>
    %34 = arith.addf %31, %33 : vector<16x128xf32>
    %c0_21 = arith.constant 0 : index
    %c0_22 = arith.constant 0 : index
    %c0_23 = arith.constant 0 : index
    %35 = vector.load %arg8[%c0_21, %c0_22, %c0_23] : memref<1x16x128xf32, #tpu.memory_space<vmem>>, vector<1x16x128xf32>
    %36 = vector.shape_cast %35 : vector<1x16x128xf32> to vector<16x128xf32>
    %37 = vector.shape_cast %34 : vector<16x128xf32> to vector<1x16x128xf32>
    tpu.vector_store %arg8[%c0_21, %c0_22, %c0_23], %37 {strides = array<i32>} : memref<1x16x128xf32, #tpu.memory_space<vmem>>, vector<1x16x128xf32>,
    return
  }
  func.func @transform_0(%arg0: i32) -> (i32, i32, i32) {
    %c0_i32 = arith.constant 0 : i32
    %c0_i32_0 = arith.constant 0 : i32
    %c0_i32_1 = arith.constant 0 : i32
    return %arg0, %c0_i32, %c0_i32_0 : i32, i32, i32
  }
  func.func @transform_1(%arg0: i32) -> (i32, i32) {
    %c0_i32 = arith.constant 0 : i32
    %c0_i32_0 = arith.constant 0 : i32
    %c0_i32_1 = arith.constant 0 : i32
    return %c0_i32, %c0_i32_0 : i32, i32
  }
  func.func @transform_2(%arg0: i32) -> (i32, i32) {
    %c0_i32 = arith.constant 0 : i32
    %c0_i32_0 = arith.constant 0 : i32
    %c0_i32_1 = arith.constant 0 : i32
    return %c0_i32, %c0_i32_0 : i32, i32
  }
  func.func @transform_3(%arg0: i32) -> (i32, i32) {
    %c0_i32 = arith.constant 0 : i32
    %c0_i32_0 = arith.constant 0 : i32
    %c0_i32_1 = arith.constant 0 : i32
    return %c0_i32, %c0_i32_0 : i32, i32
  }
  func.func @transform_4(%arg0: i32) -> (i32, i32) {
    %c0_i32 = arith.constant 0 : i32
    %c0_i32_0 = arith.constant 0 : i32
    %c0_i32_1 = arith.constant 0 : i32
    return %c0_i32, %c0_i32_0 : i32, i32
  }
  func.func @transform_5(%arg0: i32) -> (i32, i32) {
    %c0_i32 = arith.constant 0 : i32
    %c0_i32_0 = arith.constant 0 : i32
    %c0_i32_1 = arith.constant 0 : i32
    return %c0_i32, %c0_i32_0 : i32, i32
  }
  func.func @transform_6(%arg0: i32) -> (i32, i32) {
    %c0_i32 = arith.constant 0 : i32
    %c0_i32_0 = arith.constant 0 : i32
    %c0_i32_1 = arith.constant 0 : i32
    return %c0_i32, %c0_i32_0 : i32, i32
  }
  func.func @transform_7(%arg0: i32) -> (i32, i32, i32) {
    %c0_i32 = arith.constant 0 : i32
    %c0_i32_0 = arith.constant 0 : i32
    %c0_i32_1 = arith.constant 0 : i32
    return %arg0, %c0_i32, %c0_i32_0 : i32, i32, i32
  }
}

</mosaic_0001>

<bundles_post_ra>
// kernel: tpu_custom_call.1
= control target key start
LH: loop header
LB: loop body
LE: loop exit
PB: predicated region body
PF: predicated region fallthrough
CT: control target
= control target key end

     0   :  { %s2582_s0 = inlined_call_operand.hbm [shape: f32[2,16,128], index: 0, kind: input, shape index: {}]   ;;  %s2583_s1 = inlined_call_operand.hbm [shape: bf16[128,512], index: 1, kind: input, shape index: {}]   ;;  %s2584_s2 = inlined_call_operand.hbm [shape: bf16[128,512], index: 2, kind: input, shape index: {}]   ;;  %s2585_s3 = inlined_call_operand.hbm [shape: bf16[128,512], index: 3, kind: input, shape index: {}]   ;;  %s2586_s4 = inlined_call_operand.hbm [shape: f32[16,512], index: 4, kind: input, shape index: {}]   ;;  %s2587_s5 = inlined_call_operand.hbm [shape: bf16[256,128], index: 5, kind: input, shape index: {}]   ;;  %s2588_s6 = inlined_call_operand.vmem [shape: f32[1,128], index: 6, kind: input, shape index: {}]   ;;  %s2589_s7 = inlined_call_operand.hbm [shape: f32[2,16,128], index: 7, kind: output, shape index: {}]  }
   0x1   :  { %2594 = sst [smem:[#allocation19_spill]] %s2583_s1 }
   0x2   :  { %12 = vsyncpa [#allocation3], 0 }
   0x3   :  { %14 = vsyncpa [#allocation3 + $0x1], 0 }
   0x4   :  { %15 = vsyncpa [#allocation6], 0 }
   0x5   :  { %16 = vsyncpa [#allocation9], 0 }
   0x6   :  { %17 = vsyncpa [#allocation12], 0 }
   0x7   :  { %18 = vsyncpa [#allocation4], 0 }
   0x8   :  { %20 = vsyncpa [#allocation4 + $0x1], 0  ;;  %s2320_s24 = smov 0   ;;  %s2322_s25 = smov 0  }
   0x9   :  { %s2324_s26 = smov 0   ;;  %s2326_s27 = smov 0  }
   0xa LB: > { %s2262_s28 = smov [#allocation5]   ;;  %s2341_s30 = sadd.s32 4294967295, %s2260_s27   ;;  %s2260_s27 = sphi %s2326_s27, %s2619_s27   ;;  %s2256_s26 = sphi %s2324_s26, %s2618_s26   ;;  %s2252_s25 = sphi %s2322_s25, %s2617_s25   ;;  %s2248_s24 = sphi %s2320_s24, %s2616_s24  }
   0xb   : > { %s221_s29 = sshll.u32 %s2262_s28, 4  ;;  %p1584_p0 = scmp.ge.s32.totalorder %s2260_s27, 1  ;;  %s222_s29 = int_to_ptr.vmem [resolvable:$true] %s221_s29 }
   0xc   : > { %p2590_p1 = scmp.eq.s32.totalorder %s2341_s30, 0  ;;  %p209_p2 = scmp.lt.s32.totalorder %s2260_s27, 3 }
   0xd   : > { %s2263_s9 = smov [#allocation8]   ;;  %s2264_s12 = smov [#allocation7]  }
   0xe   : > { %p2346_p3 = pnand %p1584_p0, %p209_p2  ;;  %s247_s10 = sshll.u32 %s2263_s9, 4  ;;  %s2359_s10 = int_to_ptr.vmem [resolvable:$true] %s247_s10 }
   0xf   : > { %s234_s13 = sshll.u32 %s2264_s12, 4  ;;  %s2037_s15 = scalar_lea.vmem %s222_s29, 4096  ;;  %s2361_s13 = int_to_ptr.vmem [resolvable:$true] %s234_s13 }
  0x10   : > { %s2595_s8 = scalar_select %p2346_p3, 1, 0 }
  0x11   : > { %p1774_p5 = pneg %p2346_p3  ;;  %p2038_p8 = scmp.ne.s32.totalorder %s222_s29, %s2037_s15 }
  0x12   : > { %p2045_p11 = scmp.lt.s32.totalorder %s222_s29, %s222_s29  ;;  %p2046_p12 = scmp.lt.s32.totalorder %s2037_s15, %s2037_s15 }
  0x13   : > { %p2355_p6 = pnand %p1774_p5, %p2590_p1 }
  0x14   : > { %p2047_p13 = por %p2046_p12, %p2045_p11 }
  0x15   : > { %p2365_p7 = pneg %p2355_p6 }
  0x17   : > { %p2040_p9 = pnand %p2038_p8, %p2365_p7 }
  0x19   : > { %p2041_p10 = pneg %p2040_p9 }
  0x1b   : > { %p2048_p0 = pnand %p2047_p13, %p2041_p10 }
  0x1d   : > { %2051 = shalt.err (!%p2048_p0)
}
  0x1e   : > { %s2265_s16 = smov 256   ;;  %s2266_s17 = smov 16  }
  0x1f   : > { %s2598_s1 = sld [smem:[#allocation19_spill]]  ;;  %s2063_s20 = scalar_lea.vmem %s2359_s10, 4096 }
  0x20   : > { %p2064_p2 = scmp.ne.s32.totalorder %s2359_s10, %s2063_s20  ;;  %p2071_p9 = scmp.lt.s32.totalorder %s2359_s10, %s2359_s10 }
  0x21   : > { %p2072_p10 = scmp.lt.s32.totalorder %s2063_s20, %s2063_s20 }
  0x22   : > { %p2066_p5 = pnand %p2064_p2, %p2365_p7 }
  0x23   : > { %p2073_p11 = por %p2072_p10, %p2071_p9 }
  0x24   : > { %p2067_p8 = pneg %p2066_p5 }
  0x25   : > { %1777 = dma.hbm_to_vmem [thread:$0]  (!%p2355_p6), %s2598_s1, 4096, %s222_s29, [#allocation6], %s2265_s16, %s2265_s16, %s2266_s17  }
  0x26   : > { %p2074_p12 = pnand %p2073_p11, %p2067_p8 }
  0x28   : > { %2077 = shalt.err (!%p2074_p12)
}
  0x29   : > { %1783 = dma.hbm_to_vmem [thread:$0]  (!%p2355_p6), %s2585_s3, 4096, %s2359_s10, [#allocation9], %s2265_s16, %s2265_s16, %s2266_s17  }
  0x2a   : > { %s2089_s23 = scalar_lea.vmem %s2361_s13, 4096  ;;  %p2097_p5 = scmp.lt.s32.totalorder %s2361_s13, %s2361_s13 }
  0x2b   : > { %p2090_p13 = scmp.ne.s32.totalorder %s2361_s13, %s2089_s23  ;;  %p2098_p8 = scmp.lt.s32.totalorder %s2089_s23, %s2089_s23 }
  0x2d   : > { %p2092_p0 = pnand %p2090_p13, %p2365_p7  ;;  %p2099_p9 = por %p2098_p8, %p2097_p5 }
  0x2f   : > { %p2093_p2 = pneg %p2092_p0 }
  0x31   : > { %p2100_p10 = pnand %p2099_p9, %p2093_p2 }
  0x33   : > { %2103 = shalt.err (!%p2100_p10)
}
  0x34   : > { %1780 = dma.hbm_to_vmem [thread:$0]  (!%p2355_p6), %s2584_s2, 4096, %s2361_s13, [#allocation6], %s2265_s16, %s2265_s16, %s2266_s17  }
  0x35   : > { %s2267_s9 = smov [#allocation10]  }
  0x36   : > { %s260_s10 = sshll.u32 %s2267_s9, 4  ;;  %s261_s10 = int_to_ptr.vmem [resolvable:$true] %s260_s10 }
  0x37   : > { %s2115_s12 = scalar_lea.vmem %s261_s10, 1024  ;;  %p2123_p0 = scmp.lt.s32.totalorder %s261_s10, %s261_s10 }
  0x38   : > { %p2116_p11 = scmp.ne.s32.totalorder %s261_s10, %s2115_s12  ;;  %p2124_p5 = scmp.lt.s32.totalorder %s2115_s12, %s2115_s12 }
  0x3a   : > { %p2118_p12 = pnand %p2116_p11, %p2365_p7  ;;  %p2125_p2 = por %p2124_p5, %p2123_p0 }
  0x3c   : > { %p2119_p13 = pneg %p2118_p12 }
  0x3e   : > { %p2126_p8 = pnand %p2125_p2, %p2119_p13 }
  0x40   : > { %2129 = shalt.err (!%p2126_p8)
}
  0x41   : > { %s2268_s15 = smov 512   ;;  %s2269_s18 = smov 32  }
  0x42   : > { %1786 = dma.hbm_to_vmem [thread:$0]  (!%p2355_p6), %s2586_s4, 1024, %s261_s10, [#allocation9], %s2268_s15, %s2268_s15, %s2269_s18  }
  0x43   : > { %s2270_s16 = smov [#allocation11]  }
  0x44   : > { %s273_s17 = sshll.u32 %s2270_s16, 4  ;;  %s274_s17 = int_to_ptr.vmem [resolvable:$true] %s273_s17 }
  0x45   : > { %s2141_s20 = scalar_lea.vmem %s274_s17, 2048  ;;  %p2149_p12 = scmp.lt.s32.totalorder %s274_s17, %s274_s17 }
  0x46   : > { %p2142_p9 = scmp.ne.s32.totalorder %s274_s17, %s2141_s20  ;;  %p2150_p13 = scmp.lt.s32.totalorder %s2141_s20, %s2141_s20 }
  0x48   : > { %p2144_p10 = pnand %p2142_p9, %p2365_p7  ;;  %p2151_p0 = por %p2150_p13, %p2149_p12 }
  0x4a   : > { %p2145_p11 = pneg %p2144_p10 }
  0x4c   : > { %p2152_p5 = pnand %p2151_p0, %p2145_p11 }
  0x4e   : > { %2155 = shalt.err (!%p2152_p5)
}
  0x4f   : > { %s2271_s21 = smov 64   ;;  %s2272_s14 = smov 4  }
  0x50   : > { %1789 = dma.hbm_to_vmem [thread:$0]  (!%p2355_p6), %s2587_s5, 2048, %s274_s17, [#allocation12], %s2271_s21, %s2271_s21, %s2272_s14  }
  0x51   : > { %s1583_s28 = sadd.s32 4294967294, %s2260_s27   ;;  %s2416_s29 = sadd.s32 1, %s2260_s27  }
  0x52   : > { %s33_s9 = sadd.s32 1, %s2256_s26  ;;  %s30_s10 = ssub.s32 %s2260_s27, %s2416_s29 }
  0x53   : > { %p40_p7 = scmp.ne.s32.totalorder %s2256_s26, %s2252_s25  ;;  %p31_p2 = scmp.eq.s32.totalorder %s30_s10, 0 }
  0x54   : > { %p41_p8 = scmp.eq.s32.totalorder %s2260_s27, 0  ;;  %p46_p9 = scmp.ne.s32.totalorder %s2252_s25, %s2248_s24 }
  0x55   : > { %p196_p10 = scmp.eq.s32.totalorder %s2341_s30, 1  ;;  %p202_p13 = scmp.eq.s32.totalorder %s1583_s28, 1 }
  0x56   : > { %s2428_s12 = scalar_select %p31_p2, %s2256_s26, %s33_s9  }
  0x57   : > { %p42_p11 = por %p41_p8, %p40_p7  ;;  %p2432_p12 = por %p2590_p1, %p46_p9 }
  0x58   : > { %p2436_p6 = por %p196_p10, %p40_p7  ;;  %p1803_p0 = scmp.lt.s32.totalorder %s2260_s27, 2 }
  0x59   : > { %s2599_s11 = scalar_select %p2432_p12, 1, 0 }
  0x5a   : > { %s2600_s15 = scalar_select %p2436_p6, 1, 0 }
  0x5b   : > { %s290_s18 = sand.u32 1, %s2256_s26   ;;  %p2442_p5 = por %p202_p13, %p46_p9 }
  0x5c   : > { %s1591_s13 = sshll.u32 %s290_s18, 4  ;;  %s1726_s16 = sshll.u32 %s2260_s27, 8 }
  0x5d   : > { %s2601_s19 = scalar_select %p2442_p5, 1, 0 }
  0x5e   : > { %s2450_s21 = scalar_lea.hbm %s2582_s0, %s1726_s16  ;;  %s294_s14 = scalar_lea.vmem [#allocation2], %s1591_s13 }
  0x5f   : > { %s301_s22 = sshll.u32 %s294_s14, 4  ;;  %p2452_p7 = pnand %p1803_p0, %p42_p11  ;;  %s2456_s22 = int_to_ptr.vmem [resolvable:$true] %s301_s22 }
  0x60   : > { %s2458_s28 = scalar_lea.sflag [#allocation3], %s290_s18  ;;  %s2156_s9 = scalar_lea.hbm %s2450_s21, 256 }
  0x61   : > { %p2157_p2 = scmp.ne.s32.totalorder %s2450_s21, %s2156_s9  ;;  %p2158_p8 = pneg %p2452_p7 }
  0x62   : > { %s2161_s13 = scalar_lea.hbm %s2582_s0, 512  ;;  %p2162_p11 = scmp.lt.s32.totalorder %s2450_s21, %s2582_s0 }
  0x63   : > { %p2159_p9 = pnand %p2158_p8, %p2157_p2  ;;  %p2163_p13 = scmp.lt.s32.totalorder %s2161_s13, %s2156_s9 }
  0x65   : > { %p2160_p10 = pneg %p2159_p9  ;;  %p2164_p0 = por %p2163_p13, %p2162_p11 }
  0x67   : > { %p2165_p4 = pnand %p2164_p0, %p2160_p10 }
  0x69   : > { %2168 = shalt.err (!%p2165_p4)
}
  0x6a   : > { %s2169_s18 = scalar_lea.vmem %s2456_s22, 256  ;;  %s2273_s14 = smov [#allocation2]  }
  0x6b   : > { %p2170_p1 = scmp.ne.s32.totalorder %s2456_s22, %s2169_s18  ;;  %s2174_s1 = sshll.u32 %s2273_s14, 4  ;;  %s2175_s1 = int_to_ptr.vmem [resolvable:$false] %s2174_s1 }
  0x6c   : > { %s2176_s10 = scalar_lea.vmem %s2175_s1, 512  ;;  %p2177_p9 = scmp.lt.s32.totalorder %s2456_s22, %s2175_s1 }
  0x6d   : > { %p2172_p5 = pnand %p2170_p1, %p2158_p8  ;;  %p2178_p6 = scmp.lt.s32.totalorder %s2176_s10, %s2169_s18 }
  0x6f   : > { %p2173_p2 = pneg %p2172_p5  ;;  %p2179_p12 = por %p2178_p6, %p2177_p9 }
  0x71   : > { %p2180_p3 = pnand %p2179_p12, %p2173_p2 }
  0x73   : > { %2183 = shalt.err (!%p2180_p3)
}
  0x74   : > { %s2274_s9 = smov 128   ;;  %s2275_s16 = smov 8  }
  0x75   : > { %1793 = dma.hbm_to_vmem [thread:$0]  (!%p2452_p7), %s2450_s21, 256, %s2456_s22, %s2458_s28, %s2274_s9, %s2274_s9, %s2275_s16  }
  0x76   : > { %p2603_p1 = scmp.ne.s32.totalorder %s2595_s8, 0 }
  0x77   : > { %s2482_s13 = sand.u32 (!%p2603_p1), 1, %s2252_s25   ;;  %p2604_p3 = scmp.ne.s32.totalorder (!%p2603_p1), %s2599_s11, 0 }
  0x78   : > { %313 = sbr.rel (%p2603_p1) target bundleno = 678 (0x2a6), region = 48  ;;  %s1595_s1 = sshll.u32 (!%p2603_p1), %s2482_s13, 4 }
  0x79   : > { %s316_s17 = scalar_lea.sflag (!%p2603_p1), [#allocation3], %s2482_s13  ;;  %s2488_s20 = scalar_lea.vmem (!%p2603_p1), [#allocation2], %s1595_s1 }
  0x7d   : > { %2227 = dma.done.wait (%p2604_p3), %s316_s17, 256  }
  0x7e   : > { %2229 = vsyncadd (%p2604_p3), %s316_s17, 4294967040  ;;  %p2605_p4 = scmp.eq.s32.totalorder %s2341_s30, 0 }
  0x80   : > { %2231 = dma.done.wait (%p2605_p4), [#allocation6], 8192   ;;  %p2606_p12 = pmov %p2605_p4 }
  0x81   : > { %p2607_p6 = pmov %p2605_p4 }
  0x82   : > { %2233 = vsyncadd (%p2606_p12), [#allocation6], 4294959104 }
  0x83   : > { %2235 = dma.done.wait (%p2607_p6), [#allocation9], 5120   ;;  %p2608_p5 = pmov %p2605_p4 }
  0x84   : > { %p2609_p7 = pmov %p2605_p4 }
  0x85   : > { %2237 = vsyncadd (%p2608_p5), [#allocation9], 4294962176 }
  0x86   : > { %2239 = dma.done.wait (%p2609_p7), [#allocation12], 2048   ;;  %p2610_p8 = pmov %p2605_p4 }
  0x87   : > { %v2276_v0 = vmov 0   ;;  %v1858_v1 = vld [vmem:[#allocation7 + $0xe4] ss:$16 sps:$4 sm:$0xff]   ;;  %v1860_v2 = vld [vmem:[#allocation7 + $0xec] ss:$16 sps:$4 sm:$0xff]   ;;  %vm376_vm0 = vcmask 1040384  }
  0x88   : > { %2241 = vsyncadd (%p2610_p8), [#allocation12], 4294965248  ;;  %642 = vmatprep.mubr.bf16.mxu0 %v2276_v0  ;;  %685 = vmatprep.mubr.bf16.mxu1 %v2276_v0  ;;  %v1862_v3 = vld [vmem:[#allocation7 + $0xe0] ss:$16 sps:$4 sm:$0xff]   ;;  %v1863_v4 = vld [vmem:[#allocation7 + $0xe8] ss:$16 sps:$4 sm:$0xff]  }
  0x89   : > { %610 = vmatprep.subr.bf16.mxu0 %v1858_v1  ;;  %653 = vmatprep.subr.bf16.mxu1 %v1860_v2  ;;  %v1864_v5 = vld [vmem:[#allocation7 + $0xc4] ss:$16 sps:$4 sm:$0xff]   ;;  %v1866_v6 = vld [vmem:[#allocation7 + $0xcc] ss:$16 sps:$4 sm:$0xff]   ;;  %v1868_v7 = vld [vmem:[#allocation7 + $0xc0] ss:$16 sps:$4 sm:$0xff]  }
  0x8a   : > { %611 = vmatpush1.bf16.msra.mxu0 %v1862_v3  ;;  %654 = vmatpush1.bf16.msra.mxu1 %v1863_v4  ;;  %v1869_v8 = vld [vmem:[#allocation7 + $0xc8] ss:$16 sps:$4 sm:$0xff]   ;;  %v1870_v9 = vld [vmem:[#allocation7 + $0xa4] ss:$16 sps:$4 sm:$0xff]   ;;  %v1872_v10 = vld [vmem:[#allocation7 + $0xac] ss:$16 sps:$4 sm:$0xff]  }
  0x8b   : > { %612 = vmatprep.subr.bf16.mxu0 %v1864_v5  ;;  %655 = vmatprep.subr.bf16.mxu1 %v1866_v6  ;;  %v1874_v11 = vld [vmem:[#allocation7 + $0xa0] ss:$16 sps:$4 sm:$0xff]   ;;  %v1875_v12 = vld [vmem:[#allocation7 + $0xa8] ss:$16 sps:$4 sm:$0xff]   ;;  %v1876_v13 = vld [vmem:[#allocation7 + $0x84] ss:$16 sps:$4 sm:$0xff]  }
  0x8c   : > { %v1878_v14 = vld [vmem:[#allocation7 + $0x8c] ss:$16 sps:$4 sm:$0xff]   ;;  %v1880_v15 = vld [vmem:[#allocation7 + $0x80] ss:$16 sps:$4 sm:$0xff]   ;;  %v1881_v16 = vld [vmem:[#allocation7 + $0x88] ss:$16 sps:$4 sm:$0xff]  }
  0x8d   : > { %v1882_v17 = vld [vmem:[#allocation7 + $0x64] ss:$16 sps:$4 sm:$0xff]   ;;  %v1884_v18 = vld [vmem:[#allocation7 + $0x6c] ss:$16 sps:$4 sm:$0xff]   ;;  %v1886_v19 = vld [vmem:[#allocation7 + $0x60] ss:$16 sps:$4 sm:$0xff]  }
  0x8e   : > { %613 = vmatpush1.bf16.msra.mxu0 %v1868_v7  ;;  %656 = vmatpush1.bf16.msra.mxu1 %v1869_v8  ;;  %v1887_v20 = vld [vmem:[#allocation7 + $0x68] ss:$16 sps:$4 sm:$0xff]   ;;  %v1888_v21 = vld [vmem:[#allocation7 + $0x44] ss:$16 sps:$4 sm:$0xff]   ;;  %v1890_v22 = vld [vmem:[#allocation7 + $0x4c] ss:$16 sps:$4 sm:$0xff]  }
  0x8f   : > { %614 = vmatprep.subr.bf16.mxu0 %v1870_v9  ;;  %657 = vmatprep.subr.bf16.mxu1 %v1872_v10  ;;  %v1892_v23 = vld [vmem:[#allocation7 + $0x40] ss:$16 sps:$4 sm:$0xff]   ;;  %v1893_v24 = vld [vmem:[#allocation7 + $0x48] ss:$16 sps:$4 sm:$0xff]   ;;  %v1894_v25 = vld [vmem:[#allocation7 + $0x24] ss:$16 sps:$4 sm:$0xff]  }
  0x90   : > { %v1896_v26 = vld [vmem:[#allocation7 + $0x2c] ss:$16 sps:$4 sm:$0xff]   ;;  %v1898_v27 = vld [vmem:[#allocation7 + $0x20] ss:$16 sps:$4 sm:$0xff]   ;;  %v1899_v28 = vld [vmem:[#allocation7 + $0x28] ss:$16 sps:$4 sm:$0xff]  }
  0x91   : > { %v1900_v29 = vld [vmem:[#allocation7 + $0x4] ss:$16 sps:$4 sm:$0xff]   ;;  %v1902_v30 = vld [vmem:[#allocation7 + $0xc] ss:$16 sps:$4 sm:$0xff]   ;;  %v1904_v31 = vld [vmem:[#allocation7] ss:$16 sps:$4 sm:$0xff]  }
  0x92   : > { %615 = vmatpush1.bf16.msra.mxu0 %v1874_v11  ;;  %658 = vmatpush1.bf16.msra.mxu1 %v1875_v12  ;;  %v1905_v32 = vld [vmem:[#allocation7 + $0x8] ss:$16 sps:$4 sm:$0xff]   ;;  %v371_v33 = vld [vmem:[%s2488_s20] sm:$0xff]  ;;  %v1911_v36 = vld [vmem:[#allocation5 + $0xec] ss:$16 sps:$4 sm:$0xff]   ;;  %vm382_vm2 = vcmask 1046528  }
  0x93   : > { %616 = vmatprep.subr.bf16.mxu0 %v1876_v13  ;;  %659 = vmatprep.subr.bf16.mxu1 %v1878_v14  ;;  %v372_v34 = vld [vmem:[%s2488_s20 + $0x8] sm:$0xff]  ;;  %v1908_v35 = vld [vmem:[#allocation5 + $0xe4] ss:$16 sps:$4 sm:$0xff]   ;;  %v1906_v38 = vld [vmem:[#allocation5 + $0xe0] ss:$16 sps:$4 sm:$0xff]   ;;  %s369_s21 = scalar_lea.vmem [#allocation13], %s1595_s1 }
  0x94   : > { %v2510_v37 = vpack.c.bf16 %v372_v34, %v371_v33  ;;  %v1909_v39 = vld [vmem:[#allocation5 + $0xe8] ss:$16 sps:$4 sm:$0xff]   ;;  %v1914_v40 = vld [vmem:[#allocation5 + $0xc4] ss:$16 sps:$4 sm:$0xff]   ;;  %v1917_v41 = vld [vmem:[#allocation5 + $0xcc] ss:$16 sps:$4 sm:$0xff]  }
  0x95   : > { %v1912_v42 = vld [vmem:[#allocation5 + $0xc0] ss:$16 sps:$4 sm:$0xff]   ;;  %v1915_v43 = vld [vmem:[#allocation5 + $0xc8] ss:$16 sps:$4 sm:$0xff]   ;;  %v1920_v44 = vld [vmem:[#allocation5 + $0xa4] ss:$16 sps:$4 sm:$0xff]  }
  0x96   : > { %617 = vmatpush1.bf16.msra.mxu0 %v1880_v15  ;;  %660 = vmatpush1.bf16.msra.mxu1 %v1881_v16  ;;  %v1923_v45 = vld [vmem:[#allocation5 + $0xac] ss:$16 sps:$4 sm:$0xff]   ;;  %v1918_v46 = vld [vmem:[#allocation5 + $0xa0] ss:$16 sps:$4 sm:$0xff]   ;;  %v1921_v47 = vld [vmem:[#allocation5 + $0xa8] ss:$16 sps:$4 sm:$0xff]  }
  0x97   : > { %618 = vmatprep.subr.bf16.mxu0 %v1882_v17  ;;  %661 = vmatprep.subr.bf16.mxu1 %v1884_v18  ;;  %v1926_v48 = vld [vmem:[#allocation5 + $0x84] ss:$16 sps:$4 sm:$0xff]   ;;  %v1929_v49 = vld [vmem:[#allocation5 + $0x8c] ss:$16 sps:$4 sm:$0xff]   ;;  %v1924_v50 = vld [vmem:[#allocation5 + $0x80] ss:$16 sps:$4 sm:$0xff]  }
  0x98   : > { %v1927_v51 = vld [vmem:[#allocation5 + $0x88] ss:$16 sps:$4 sm:$0xff]   ;;  %v1932_v52 = vld [vmem:[#allocation5 + $0x64] ss:$16 sps:$4 sm:$0xff]   ;;  %v1935_v53 = vld [vmem:[#allocation5 + $0x6c] ss:$16 sps:$4 sm:$0xff]  }
  0x99   : > { %v1930_v54 = vld [vmem:[#allocation5 + $0x60] ss:$16 sps:$4 sm:$0xff]   ;;  %v1933_v55 = vld [vmem:[#allocation5 + $0x68] ss:$16 sps:$4 sm:$0xff]   ;;  %v1938_v56 = vld [vmem:[#allocation5 + $0x44] ss:$16 sps:$4 sm:$0xff]  }
  0x9a   : > { %619 = vmatpush1.bf16.msra.mxu0 %v1886_v19  ;;  %662 = vmatpush1.bf16.msra.mxu1 %v1887_v20  ;;  %v1941_v57 = vld [vmem:[#allocation5 + $0x4c] ss:$16 sps:$4 sm:$0xff]   ;;  %v1936_v58 = vld [vmem:[#allocation5 + $0x40] ss:$16 sps:$4 sm:$0xff]   ;;  %v1939_v59 = vld [vmem:[#allocation5 + $0x48] ss:$16 sps:$4 sm:$0xff]  }
  0x9b   : > { %620 = vmatprep.subr.bf16.mxu0 %v1888_v21  ;;  %663 = vmatprep.subr.bf16.mxu1 %v1890_v22  ;;  %v1944_v60 = vld [vmem:[#allocation5 + $0x24] ss:$16 sps:$4 sm:$0xff]   ;;  %v1947_v61 = vld [vmem:[#allocation5 + $0x2c] ss:$16 sps:$4 sm:$0xff]   ;;  %v1942_v62 = vld [vmem:[#allocation5 + $0x20] ss:$16 sps:$4 sm:$0xff]  }
  0x9c   : > { %v1945_v63 = vld [vmem:[#allocation5 + $0x28] ss:$16 sps:$4 sm:$0xff]   ;;  %v1950_v1 = vld [vmem:[#allocation5 + $0x4] ss:$16 sps:$4 sm:$0xff]   ;;  %v1953_v2 = vld [vmem:[#allocation5 + $0xc] ss:$16 sps:$4 sm:$0xff]  }
  0x9d   : > { %vm2516_vm1 = vmneg %vm376_vm0  ;;  %v1948_v4 = vld [vmem:[#allocation5] ss:$16 sps:$4 sm:$0xff]   ;;  %v1951_v5 = vld [vmem:[#allocation5 + $0x8] ss:$16 sps:$4 sm:$0xff]   ;;  %v375_v9 = vrot.slane %v2510_v37, 7  ;;  %s1462_s22 = sshll.u32 %s369_s21, 4  ;;  %s2534_s22 = int_to_ptr.vmem [resolvable:$true] %s1462_s22 }
  0x9e   : > { %621 = vmatpush1.bf16.msra.mxu0 %v1892_v23  ;;  %664 = vmatpush1.bf16.msra.mxu1 %v1893_v24  ;;  %v1956_v6 = vld [vmem:[#allocation8 + $0xe4] ss:$16 sps:$4 sm:$0xff]   ;;  %v1959_v7 = vld [vmem:[#allocation8 + $0xec] ss:$16 sps:$4 sm:$0xff]   ;;  %v1954_v8 = vld [vmem:[#allocation8 + $0xe0] ss:$16 sps:$4 sm:$0xff]  }
  0x9f   : > { %622 = vmatprep.subr.bf16.mxu0 %v1894_v25  ;;  %665 = vmatprep.subr.bf16.mxu1 %v1896_v26  ;;  %v1957_v10 = vld [vmem:[#allocation8 + $0xe8] ss:$16 sps:$4 sm:$0xff]   ;;  %v1962_v11 = vld [vmem:[#allocation8 + $0xc4] ss:$16 sps:$4 sm:$0xff]   ;;  %v1965_v12 = vld [vmem:[#allocation8 + $0xcc] ss:$16 sps:$4 sm:$0xff]  }
  0xa0   : > { %v1960_v13 = vld [vmem:[#allocation8 + $0xc0] ss:$16 sps:$4 sm:$0xff]   ;;  %v1963_v14 = vld [vmem:[#allocation8 + $0xc8] ss:$16 sps:$4 sm:$0xff]   ;;  %v1968_v15 = vld [vmem:[#allocation8 + $0xa4] ss:$16 sps:$4 sm:$0xff]  }
  0xa1   : > { %v1971_v16 = vld [vmem:[#allocation8 + $0xac] ss:$16 sps:$4 sm:$0xff]   ;;  %v1966_v17 = vld [vmem:[#allocation8 + $0xa0] ss:$16 sps:$4 sm:$0xff]   ;;  %v1969_v18 = vld [vmem:[#allocation8 + $0xa8] ss:$16 sps:$4 sm:$0xff]  }
  0xa2   : > { %623 = vmatpush1.bf16.msra.mxu0 %v1898_v27  ;;  %666 = vmatpush1.bf16.msra.mxu1 %v1899_v28  ;;  %v1974_v19 = vld [vmem:[#allocation8 + $0x84] ss:$16 sps:$4 sm:$0xff]   ;;  %v1977_v20 = vld [vmem:[#allocation8 + $0x8c] ss:$16 sps:$4 sm:$0xff]   ;;  %v1972_v21 = vld [vmem:[#allocation8 + $0x80] ss:$16 sps:$4 sm:$0xff]  }
  0xa3   : > { %624 = vmatprep.subr.bf16.mxu0 %v1900_v29  ;;  %667 = vmatprep.subr.bf16.mxu1 %v1902_v30  ;;  %v1975_v22 = vld [vmem:[#allocation8 + $0x88] ss:$16 sps:$4 sm:$0xff]   ;;  %v1980_v23 = vld [vmem:[#allocation8 + $0x64] ss:$16 sps:$4 sm:$0xff]   ;;  %v1983_v24 = vld [vmem:[#allocation8 + $0x6c] ss:$16 sps:$4 sm:$0xff]  }
  0xa4   : > { %v1978_v25 = vld [vmem:[#allocation8 + $0x60] ss:$16 sps:$4 sm:$0xff]   ;;  %v1981_v26 = vld [vmem:[#allocation8 + $0x68] ss:$16 sps:$4 sm:$0xff]   ;;  %v1989_v27 = vld [vmem:[#allocation8 + $0x4c] ss:$16 sps:$4 sm:$0xff]  }
  0xa5   : > { %v1984_v28 = vld [vmem:[#allocation8 + $0x40] ss:$16 sps:$4 sm:$0xff]   ;;  %v1987_v29 = vld [vmem:[#allocation8 + $0x48] ss:$16 sps:$4 sm:$0xff]   ;;  %v1992_v30 = vld [vmem:[#allocation8 + $0x24] ss:$16 sps:$4 sm:$0xff]  }
  0xa6   : > { %625 = vmatpush1.bf16.msra.mxu0 %v1904_v31  ;;  %668 = vmatpush1.bf16.msra.mxu1 %v1905_v32  ;;  %v1995_v31 = vld [vmem:[#allocation8 + $0x2c] ss:$16 sps:$4 sm:$0xff]   ;;  %v1990_v32 = vld [vmem:[#allocation8 + $0x20] ss:$16 sps:$4 sm:$0xff]   ;;  %v1993_v33 = vld [vmem:[#allocation8 + $0x28] ss:$16 sps:$4 sm:$0xff]  }
  0xa7   : > { %856 = vmatprep.subr.bf16.mxu0 %v1908_v35  ;;  %899 = vmatprep.subr.bf16.mxu1 %v1911_v36  ;;  %v1998_v34 = vld [vmem:[#allocation8 + $0x4] ss:$16 sps:$4 sm:$0xff]   ;;  %v2001_v35 = vld [vmem:[#allocation8 + $0xc] ss:$16 sps:$4 sm:$0xff]   ;;  %v1996_v36 = vld [vmem:[#allocation8] ss:$16 sps:$4 sm:$0xff]  }
  0xa8   : > { %s1727_s23 = sshll.u32 %s2341_s30, 8  ;;  %s1449_s10 = scalar_lea.sflag [#allocation4], %s2482_s13 }
  0xa9   : > { %643 = vmatmul.mubr.bf16.vlgmr.msra.gmra.mxu0 %v2510_v37  ;;  %686 = vmatmul.mubr.bf16.vlgmr.msra.gmra.mxu1 %v2510_v37  ;;  %s2539_s14 = scalar_lea.hbm %s2589_s7, %s1727_s23  ;;  %s2184_s9 = scalar_lea.vmem %s2534_s22, 256 }
  0xaa   : > { %857 = vmatpush1.bf16.msra.mxu0 %v1906_v38  ;;  %900 = vmatpush1.bf16.msra.mxu1 %v1909_v39  ;;  %v1999_v38 = vld [vmem:[#allocation8 + $0x8] ss:$16 sps:$4 sm:$0xff]   ;;  %v381_v39 = vrot.slane %v2510_v37, 1  ;;  %p2185_p10 = scmp.ne.s32.totalorder %s2534_s22, %s2184_s9  ;;  %p2613_p11 = scmp.ne.s32.totalorder %s2600_s15, 0 }
  0xab   : > { %858 = vmatprep.subr.bf16.mxu0 %v1914_v40  ;;  %901 = vmatprep.subr.bf16.mxu1 %v1917_v41  ;;  %v2002_v40 = vld [vmem:[#allocation11 + $0x78] sm:$0xff]   ;;  %s2277_s30 = smov [#allocation13]  }
  0xac   : > { %888 = vmatprep.mubr.bf16.mxu0 %v2276_v0  ;;  %931 = vmatprep.mubr.bf16.mxu1 %v2276_v0  ;;  %v2003_v41 = vld [vmem:[#allocation11 + $0x38] sm:$0xff]   ;;  %p2186_p13 = pnand %p2185_p10, %p2613_p11  ;;  %s2188_s16 = sshll.u32 %s2277_s30, 4  ;;  %s2189_s16 = int_to_ptr.vmem [resolvable:$false] %s2188_s16 }
  0xad   : > { %v2010_v37 = vld [vmem:[#allocation11 + $0x58] sm:$0xff]   ;;  %s2190_s1 = scalar_lea.vmem %s2189_s16, 512  ;;  %p2191_p2 = scmp.lt.s32.totalorder %s2534_s22, %s2189_s16 }
  0xae   : > { %859 = vmatpush1.bf16.msra.mxu0 %v1912_v42  ;;  %902 = vmatpush1.bf16.msra.mxu1 %v1915_v43  ;;  %v2004_v42 = vld [vmem:[#allocation11 + $0x70] sm:$0xff]   ;;  %p2187_p0 = pneg %p2186_p13  ;;  %p2192_p9 = scmp.lt.s32.totalorder %s2190_s1, %s2184_s9 }
  0xaf   : > { %860 = vmatprep.subr.bf16.mxu0 %v1920_v44  ;;  %903 = vmatprep.subr.bf16.mxu1 %v1923_v45  ;;  %v2005_v43 = vld [vmem:[#allocation11 + $0x30] sm:$0xff]   ;;  %v2006_v44 = vld [vmem:[#allocation11 + $0x68] sm:$0xff]  }
  0xb0   : > { %v2007_v45 = vld [vmem:[#allocation11 + $0x28] sm:$0xff]   ;;  %p2193_p1 = por %p2192_p9, %p2191_p2 }
  0xb2   : > { %861 = vmatpush1.bf16.msra.mxu0 %v1918_v46  ;;  %904 = vmatpush1.bf16.msra.mxu1 %v1921_v47  ;;  %v2008_v46 = vld [vmem:[#allocation11 + $0x60] sm:$0xff]   ;;  %p2194_p3 = pnand %p2193_p1, %p2187_p0 }
  0xb3   : > { %862 = vmatprep.subr.bf16.mxu0 %v1926_v48  ;;  %905 = vmatprep.subr.bf16.mxu1 %v1929_v49  ;;  %v2009_v47 = vld [vmem:[#allocation11 + $0x20] sm:$0xff]   ;;  %v2011_v48 = vld [vmem:[#allocation11 + $0x18] sm:$0xff]   ;;  %v2012_v49 = vld [vmem:[#allocation11 + $0x50] sm:$0xff]  }
  0xb6   : > { %863 = vmatpush1.bf16.msra.mxu0 %v1924_v50  ;;  %906 = vmatpush1.bf16.msra.mxu1 %v1927_v51  ;;  %v2013_v50 = vld [vmem:[#allocation11 + $0x10] sm:$0xff]   ;;  %v2014_v51 = vld [vmem:[#allocation11 + $0x48] sm:$0xff]  }
  0xb7   : > { %864 = vmatprep.subr.bf16.mxu0 %v1932_v52  ;;  %907 = vmatprep.subr.bf16.mxu1 %v1935_v53  ;;  %v2015_v52 = vld [vmem:[#allocation11 + $0x8] sm:$0xff]   ;;  %v2016_v53 = vld [vmem:[#allocation11 + $0x40] sm:$0xff]  }
  0xba   : > { %865 = vmatpush1.bf16.msra.mxu0 %v1930_v54  ;;  %908 = vmatpush1.bf16.msra.mxu1 %v1933_v55  ;;  %v2017_v54 = vld [vmem:[#allocation11] sm:$0xff]  }
  0xbb   : > { %866 = vmatprep.subr.bf16.mxu0 %v1938_v56  ;;  %909 = vmatprep.subr.bf16.mxu1 %v1941_v57 }
  0xbe   : > { %867 = vmatpush1.bf16.msra.mxu0 %v1936_v58  ;;  %910 = vmatpush1.bf16.msra.mxu1 %v1939_v59 }
  0xbf   : > { %868 = vmatprep.subr.bf16.mxu0 %v1944_v60  ;;  %911 = vmatprep.subr.bf16.mxu1 %v1947_v61 }
  0xc2   : > { %869 = vmatpush1.bf16.msra.mxu0 %v1942_v62  ;;  %912 = vmatpush1.bf16.msra.mxu1 %v1945_v63 }
  0xc3   : > { %870 = vmatprep.subr.bf16.mxu0 %v1950_v1  ;;  %913 = vmatprep.subr.bf16.mxu1 %v1953_v2 }
  0xc6   : > { %871 = vmatpush1.bf16.msra.mxu0 %v1948_v4  ;;  %914 = vmatpush1.bf16.msra.mxu1 %v1951_v5 }
  0xc7   : > { %1134 = vmatprep.subr.bf16.mxu0 %v1956_v6  ;;  %1177 = vmatprep.subr.bf16.mxu1 %v1959_v7 }
  0xc9   : > { %1667 = vmatmul.mubr.msk.bf16.vlgmr.msra.gmra.mxu0 %vm2516_vm1, %v375_v9  ;;  %1669 = vmatmul.mubr.msk.bf16.vlgmr.msra.gmra.mxu1 %vm2516_vm1, %v375_v9 }
  0xca   : > { %1135 = vmatpush1.bf16.msra.mxu0 %v1954_v8  ;;  %1178 = vmatpush1.bf16.msra.mxu1 %v1957_v10  ;;  %v1228_v8 = vld [vmem:[#allocation10] sm:$0xff] }
  0xcb   : > { %1136 = vmatprep.subr.bf16.mxu0 %v1962_v11  ;;  %1179 = vmatprep.subr.bf16.mxu1 %v1965_v12  ;;  %v1229_v12 = vld [vmem:[#allocation10 + $0x8] sm:$0xff] }
  0xcc   : > { %1166 = vmatprep.mubr.bf16.mxu0 %v2276_v0  ;;  %1209 = vmatprep.mubr.bf16.mxu1 %v2276_v0  ;;  %v1986_v0 = vld [vmem:[#allocation8 + $0x44] ss:$16 sps:$4 sm:$0xff]  }
  0xce   : > { %1137 = vmatpush1.bf16.msra.mxu0 %v1960_v13  ;;  %1180 = vmatpush1.bf16.msra.mxu1 %v1963_v14 }
  0xcf   : > { %1138 = vmatprep.subr.bf16.mxu0 %v1968_v15  ;;  %1181 = vmatprep.subr.bf16.mxu1 %v1971_v16 }
  0xd2   : > { %1139 = vmatpush1.bf16.msra.mxu0 %v1966_v17  ;;  %1182 = vmatpush1.bf16.msra.mxu1 %v1969_v18 }
  0xd3   : > { %1140 = vmatprep.subr.bf16.mxu0 %v1974_v19  ;;  %1183 = vmatprep.subr.bf16.mxu1 %v1977_v20 }
  0xd6   : > { %1141 = vmatpush1.bf16.msra.mxu0 %v1972_v21  ;;  %1184 = vmatpush1.bf16.msra.mxu1 %v1975_v22  ;;  %v1232_v21 = vld [vmem:[#allocation10 + $0x20] sm:$0xff] }
  0xd7   : > { %1142 = vmatprep.subr.bf16.mxu0 %v1980_v23  ;;  %1185 = vmatprep.subr.bf16.mxu1 %v1983_v24  ;;  %v1233_v24 = vld [vmem:[#allocation10 + $0x28] sm:$0xff] }
  0xda   : > { %1143 = vmatpush1.bf16.msra.mxu0 %v1978_v25  ;;  %1186 = vmatpush1.bf16.msra.mxu1 %v1981_v26 }
  0xdb   : > { %1144 = vmatprep.subr.bf16.mxu0 %v1986_v0  ;;  %1187 = vmatprep.subr.bf16.mxu1 %v1989_v27 }
  0xde   : > { %1145 = vmatpush1.bf16.msra.mxu0 %v1984_v28  ;;  %1188 = vmatpush1.bf16.msra.mxu1 %v1987_v29 }
  0xdf   : > { %1146 = vmatprep.subr.bf16.mxu0 %v1992_v30  ;;  %1189 = vmatprep.subr.bf16.mxu1 %v1995_v31 }
  0xe2   : > { %1147 = vmatpush1.bf16.msra.mxu0 %v1990_v32  ;;  %1190 = vmatpush1.bf16.msra.mxu1 %v1993_v33 }
  0xe3   : > { %1148 = vmatprep.subr.bf16.mxu0 %v1998_v34  ;;  %1191 = vmatprep.subr.bf16.mxu1 %v2001_v35 }
  0xe6   : > { %1149 = vmatpush1.bf16.msra.mxu0 %v1996_v36  ;;  %1192 = vmatpush1.bf16.msra.mxu1 %v1999_v38 }
  0xe7   : > { %1728 = vmatprep.subr.bf16.mxu0 %v2002_v40 }
  0xe9   : > { %1702 = vmatmul.mubr.msk.bf16.vlgmr.msra.gmra.mxu0 %vm382_vm2, %v381_v39  ;;  %1703 = vmatmul.mubr.msk.bf16.vlgmr.msra.gmra.mxu1 %vm382_vm2, %v381_v39 }
  0xea   : > { %1729 = vmatpush3.bf16.msra.mxu0 %v2003_v41 }
  0xeb   : > { %1730 = vmatprep.subr.bf16.mxu0 %v2004_v42 }
  0xee   : > { %1731 = vmatpush3.bf16.msra.mxu0 %v2005_v43 }
  0xef   : > { %1732 = vmatprep.subr.bf16.mxu0 %v2006_v44 }
  0xf2   : > { %1733 = vmatpush3.bf16.msra.mxu0 %v2007_v45 }
  0xf3   : > { %1734 = vmatprep.subr.bf16.mxu0 %v2008_v46 }
  0xf6   : > { %1735 = vmatpush3.bf16.msra.mxu0 %v2009_v47 }
  0xf7   : > { %1736 = vmatprep.subr.bf16.mxu0 %v2010_v37  ;;  %v1234_v37 = vld [vmem:[#allocation10 + $0x30] sm:$0xff] }
  0xfa   : > { %1737 = vmatpush3.bf16.msra.mxu0 %v2011_v48 }
  0xfb   : > { %1738 = vmatprep.subr.bf16.mxu0 %v2012_v49 }
  0xfe   : > { %1739 = vmatpush3.bf16.msra.mxu0 %v2013_v50 }
  0xff   : > { %1740 = vmatprep.subr.bf16.mxu0 %v2014_v51 }
 0x102   : > { %1741 = vmatpush3.bf16.msra.mxu0 %v2015_v52  ;;  %v1231_v52 = vld [vmem:[#allocation10 + $0x18] sm:$0xff] }
 0x103   : > { %1742 = vmatprep.subr.bf16.mxu0 %v2016_v53 }
 0x106   : > { %1743 = vmatpush3.bf16.msra.mxu0 %v2017_v54 }
 0x169   : > { %v644_v55 = vpop.f32.mrf.mxu0  ;;  %v687_v58 = vpop.f32.mrf.mxu1 }
 0x16b   : > { %v646_v56 = vpop.f32.mrf.mxu0  ;;  %v689_v60 = vpop.f32.mrf.mxu1 }
 0x16d   : > { %v648_v57 = vpop.f32.mrf.mxu0  ;;  %v691_v62 = vpop.f32.mrf.mxu1 }
 0x16f   : > { %v650_v59 = vpop.f32.mrf.mxu0  ;;  %v693_v1 = vpop.f32.mrf.mxu1 }
 0x189   : > { %v890_v61 = vpop.f32.mrf.mxu0  ;;  %v933_v3 = vpop.f32.mrf.mxu1 }
 0x18a   : > { %v891_v5 = vadd.f32 %v890_v61, %v644_v55  ;;  %v934_v42 = vadd.f32 %v933_v3, %v687_v58  ;;  %v1235_v55 = vld [vmem:[#allocation10 + $0x38] sm:$0xff] }
 0x18b   : > { %v892_v63 = vpop.f32.mrf.mxu0  ;;  %v935_v6 = vpop.f32.mrf.mxu1 }
 0x18c   : > { %v893_v9 = vadd.f32 %v892_v63, %v646_v56  ;;  %v936_v39 = vadd.f32 %v935_v6, %v689_v60  ;;  %v1230_v56 = vld [vmem:[#allocation10 + $0x10] sm:$0xff] }
 0x18d   : > { %v894_v2 = vpop.f32.mrf.mxu0  ;;  %v937_v16 = vpop.f32.mrf.mxu1 }
 0x18e   : > { %v895_v15 = vadd.f32 %v894_v2, %v648_v57  ;;  %v938_v36 = vadd.f32 %v937_v16, %v691_v62 }
 0x18f   : > { %v896_v4 = vpop.f32.mrf.mxu0  ;;  %v939_v0 = vpop.f32.mrf.mxu1 }
 0x190   : > { %v897_v18 = vadd.f32 %v896_v4, %v650_v59  ;;  %v940_v40 = vadd.f32 %v939_v0, %v693_v1 }
 0x1a9   : > { %v1168_v7 = vpop.f32.mrf.mxu0  ;;  %v1211_v29 = vpop.f32.mrf.mxu1 }
 0x1aa   : > { %v1220_v10 = vadd.f32 %v1168_v7, %v891_v5  ;;  %v1222_v51 = vadd.f32 %v1211_v29, %v934_v42 }
 0x1ab   : > { %v1170_v11 = vpop.f32.mrf.mxu0  ;;  %v1213_v32 = vpop.f32.mrf.mxu1 }
 0x1ac   : > { %v1236_v13 = vadd.f32 %v1228_v8, %v1220_v10  ;;  %v1221_v14 = vadd.f32 %v1170_v11, %v893_v9  ;;  %v1223_v47 = vadd.f32 %v1213_v32, %v936_v39  ;;  %v1238_v3 = vadd.f32 %v1230_v56, %v1222_v51  ;;  %v1704_v11 = vld [vmem:[%s2588_s6] ss:$0 sm:$0xff] }
 0x1ad   : > { %v1172_v17 = vpop.f32.mrf.mxu0  ;;  %v1215_v33 = vpop.f32.mrf.mxu1 }
 0x1ae   : > { %v1248_v19 = vmul.f32 0.70710677, %v1236_v13  ;;  %v1237_v20 = vadd.f32 %v1229_v12, %v1221_v14  ;;  %v1224_v22 = vadd.f32 %v1172_v17, %v895_v15  ;;  %v1226_v44 = vadd.f32 %v1215_v33, %v938_v36 }
 0x1af   : > { %v1174_v23 = vpop.f32.mrf.mxu0  ;;  %v1217_v38 = vpop.f32.mrf.mxu1  ;;  %v1244_v50 = vmul.f32 0.5, %v1236_v13  ;;  %v1239_v63 = vadd.f32 %v1231_v52, %v1223_v47 }
 0x1b0   : > { %v1249_v25 = vmul.f32 0.70710677, %v1237_v20  ;;  %v1225_v26 = vadd.f32 %v1174_v23, %v897_v18  ;;  %2018 = verf.f32 %v1248_v19  ;;  %v1240_v27 = vadd.f32 %v1232_v21, %v1224_v22 }
 0x1b1   : > { %v1245_v46 = vmul.f32 0.5, %v1237_v20  ;;  %v1227_v48 = vadd.f32 %v1217_v38, %v940_v40  ;;  %v1242_v58 = vadd.f32 %v1234_v37, %v1226_v44 }
 0x1b2   : > { %2020 = verf.f32 %v1249_v25  ;;  %v1241_v28 = vadd.f32 %v1233_v24, %v1225_v26  ;;  %v1250_v30 = vmul.f32 0.70710677, %v1240_v27  ;;  %v1246_v53 = vmul.f32 0.5, %v1240_v27 }
 0x1b3   : > { %v1243_v1 = vadd.f32 %v1235_v55, %v1227_v48 }
 0x1b4   : > { %v1251_v31 = vmul.f32 0.70710677, %v1241_v28  ;;  %2022 = verf.f32 %v1250_v30  ;;  %v1247_v59 = vmul.f32 0.5, %v1241_v28 }
 0x1b6   : > { %2024 = verf.f32 %v1251_v31 }
 0x1bd   : > { %v2019_v34 = vpop.eup %2018 }
 0x1be   : > { %v1256_v43 = vadd.f32 1.0, %v2019_v34 }
 0x1bf   : > { %v2021_v35 = vpop.eup %2020 }
 0x1c0   : > { %v1257_v41 = vadd.f32 1.0, %v2021_v35  ;;  %v1260_v61 = vmul.f32 %v1256_v43, %v1244_v50 }
 0x1c1   : > { %v2023_v45 = vpop.eup %2022 }
 0x1c2   : > { %v1258_v54 = vadd.f32 1.0, %v2023_v45  ;;  %v1261_v57 = vmul.f32 %v1257_v41, %v1245_v46  ;;  %v1264_v7 = vmul.f32 %v1260_v61, %v1238_v3 }
 0x1c3   : > { %v2025_v49 = vpop.eup %2024 }
 0x1c4   : > { %v1259_v60 = vadd.f32 1.0, %v2025_v49  ;;  %v1262_v62 = vmul.f32 %v1258_v54, %v1246_v53  ;;  %v1265_v5 = vmul.f32 %v1261_v57, %v1239_v63 }
 0x1c6   : > { %v1263_v2 = vmul.f32 %v1259_v60, %v1247_v59  ;;  %v1266_v4 = vmul.f32 %v1262_v62, %v1242_v58 }
 0x1c8   : > { %v1267_v6 = vmul.f32 %v1263_v2, %v1243_v1  ;;  %v1268_v9 = vpack.c.bf16 %v1266_v4, %v1264_v7 }
 0x1ca   : > { %v1269_v8 = vpack.c.bf16 %v1267_v6, %v1265_v5 }
 0x1cc   : > { %1437 = vmatprep.mubr.bf16.mxu0 %v1269_v8 }
 0x1cd   : > { %1438 = vmatmul.mubr.bf16.vlgmr.msra.gmra.mxu0 %v1268_v9 }
 0x28d   : > { %v1744_v10 = vpop.f32.mrf.mxu0 }
 0x28f   : > { %v1745_v12 = vpop.f32.mrf.mxu0 }
 0x290   : > { %v1746_v13 = vadd.f32 %v1745_v12, %v1744_v10 }
 0x291   : > { %v1747_v14 = vpop.f32.mrf.mxu0 }
 0x292   : > { %v1440_v15 = vadd.f32 %v1746_v13, %v1704_v11 }
 0x293   : > { %v1748_v16 = vpop.f32.mrf.mxu0 }
 0x294   : > { %1446 = vst [vmem:[%s369_s21] sm:$0xff] %v1440_v15  ;;  %v1749_v17 = vadd.f32 %v1748_v16, %v1747_v14 }
 0x296   : > { %v1443_v18 = vadd.f32 %v1749_v17, %v1704_v11 }
 0x298   : > { %1447 = vst [vmem:[%s369_s21 + $0x8] sm:$0xff] %v1443_v18 }
 0x299   : > { %2197 = shalt.err (!%p2194_p3)
}
 0x29a   : > { %s2198_s17 = scalar_lea.hbm %s2539_s14, 256  ;;  %s2202_s11 = scalar_lea.hbm %s2589_s7, 512 }
 0x29b   : > { %p2199_p4 = scmp.ne.s32.totalorder %s2539_s14, %s2198_s17  ;;  %p2203_p5 = scmp.lt.s32.totalorder %s2539_s14, %s2589_s7 }
 0x29c   : > { %p2204_p7 = scmp.lt.s32.totalorder %s2202_s11, %s2198_s17 }
 0x29d   : > { %p2200_p12 = pnand %p2199_p4, %p2613_p11 }
 0x29e   : > { %p2205_p8 = por %p2204_p7, %p2203_p5 }
 0x29f   : > { %p2201_p6 = pneg %p2200_p12 }
 0x2a1   : > { %p2206_p10 = pnand %p2205_p8, %p2201_p6 }
 0x2a3   : > { %2209 = shalt.err (!%p2206_p10)
}
 0x2a4   : > { %s2278_s28 = smov 128   ;;  %s2279_s18 = smov 8  }
 0x2a5   : > { %1772 = dma.vmem_to_hbm [thread:$0]  (%p2613_p11), %s2534_s22, 256, %s2539_s14, %s1449_s10, %s2278_s28, %s2278_s28, %s2279_s18  }
 0x2a6 PF: > { %s1477_s9 = sand.u32 1, %s2248_s24   ;;  %p2614_p13 = scmp.ne.s32.totalorder %s2601_s19, 0 }
 0x2a7   : > { %p2615_p0 = scmp.ge.s32.totalorder %s2260_s27, 2  ;;  %s1478_s30 = scalar_lea.sflag [#allocation4], %s1477_s9 }
 0x2a9   : > { %p1795_p2 = pnand %p2615_p0, %p2614_p13 }
 0x2ab   : > { %p1796_p9 = pneg %p1795_p2 }
 0x2ad   : > { %2243 = dma.done.wait (%p1796_p9), %s1478_s30, 256  }
 0x2ae   : > { %2245 = vsyncadd (%p1796_p9), %s1478_s30, 4294967040  ;;  %p23_p1 = scmp.ge.s32.totalorder %s2416_s29, 4   ;;  %s2616_s24 = smov %s2252_s25 }
 0x2af   : > { %s2617_s25 = smov %s2256_s26  ;;  %s2618_s26 = smov %s2428_s12 }
 0x2b0   : > { %s2619_s27 = smov %s2416_s29  ;;  %25 = sbr.rel (!%p23_p1) target bundleno = 10 (0xa), region = 113 }
 0x2b5   :  { %1483 = vsyncpa [#allocation3], 1 }
 0x2b6   :  { %1485 = vsyncpa [#allocation3 + $0x1], 1 }
 0x2b7   :  { %1486 = vsyncpa [#allocation6], 1 }
 0x2b8   :  { %1487 = vsyncpa [#allocation9], 1 }
 0x2b9   :  { %1488 = vsyncpa [#allocation12], 1 }
 0x2ba   :  { %1489 = vsyncpa [#allocation4], 1 }
 0x2bb   :  { %1491 = vsyncpa [#allocation4 + $0x1], 1 }

</bundles_post_ra>
